<compile_context>
chip_gen: v7x
topology: tpu7x:2x2x1
jax: 0.10.0
libtpu: 0.0.40
codegen_flags: <defaults>
</compile_context>

<pallas_src>
import math

import jax
import jax.numpy as jnp
from jax.experimental import pallas as pl
from jax.experimental.pallas import tpu as pltpu


# ----------------------------------------------------------------------------- #
# Pallas kernel: one permutation-matmul slab per (row-block, lane-block).
# ----------------------------------------------------------------------------- #
def _ps_kernel(x_ref, p_ref, o_ref):
    """x_ref: (tm, L) rows, p_ref: (L, tn) 0/1 permutation slab, o_ref: (tm, tn)."""
    y = jnp.dot(x_ref[...].astype(p_ref.dtype), p_ref[...],
                preferred_element_type=jnp.float32)
    o_ref[...] = y.astype(o_ref.dtype)


# ----------------------------------------------------------------------------- #
# Sizing helpers
# ----------------------------------------------------------------------------- #
def _vmem_budget():
    """Usable VMEM budget in bytes, generation aware (64 MiB v7x vs 128 MiB v5e/v6e)."""
    cap = 0
    try:
        info = pltpu.get_tpu_info()
        cap = int(getattr(info, "vmem_capacity_bytes", 0) or 0)
    except Exception:
        cap = 0
    if cap <= 0:
        cap = 64 << 20                       # conservative default (v7x per-TensorCore)
    return min(int(cap * 3 // 4), 96 << 20)  # leave headroom for compiler scratch


def _pick_packing(total_rows, wrr, max_lane=512, max_g=8):
    """Rows fused per packed row so the lane width g*wrr becomes a multiple of 128."""
    if wrr % 128 == 0:
        return 1
    base = 128 // math.gcd(wrr, 128)
    if base > max_g or base * wrr > max_lane or total_rows % base != 0:
        return 1                             # unpacked fallback (masked stores, still correct)
    g = base
    while (g * wrr < 256 and 2 * g <= max_g and 2 * g * wrr <= max_lane
           and total_rows % (2 * g) == 0):
        g *= 2                               # prefer >=256-wide lanes for the MXU
    return g


def _pick_lane_block(lanes, p_itemsize, budget, forced=None):
    """Output-lane tile: full width when it fits, otherwise a multiple of 128."""
    if forced is not None:
        return max(1, min(int(forced), lanes))
    lane_cap = 1024
    if lanes <= lane_cap:
        return lanes
    tn = lane_cap
    while tn > 128 and 2 * lanes * tn * p_itemsize > budget // 2:
        tn -= 128
    return max(128, tn)


def _pick_row_block(packed_rows, lanes, tn, itemsize, p_itemsize, budget):
    """Rows per block: sublane-aligned, VMEM-budgeted, >= 4 grid steps when possible."""
    align = 8 if itemsize >= 4 else (16 if itemsize == 2 else 32)
    if packed_rows <= align:
        return packed_rows                   # full-extent block (== array dim) is legal
    headroom = 4 << 20
    avail = budget - 2 * lanes * tn * p_itemsize - headroom
    per_row = 2 * (lanes + tn) * itemsize    # double-buffered input + output rows
    vmem_tm = avail // per_row if avail > 0 else align
    target = 1024                            # large blocks approach HBM roofline on v5e/v6e
    if packed_rows >= 4 * align:
        steps_tm = max(align, (packed_rows // 4 // align) * align)
    else:
        steps_tm = align
    tm = min(int(vmem_tm), target, steps_tm, packed_rows)
    return max(align, (tm // align) * align)


# ----------------------------------------------------------------------------- #
# Wrapper
# ----------------------------------------------------------------------------- #
def ps_forward_pallas(x, r, n_channel, lane_block=None):
    """Equivalent of PS(r, n_channel, batch_size).forward(x) for NCHW x (batch >= 2)."""
    b, C, H, W = x.shape
    rr = r * r
    assert C == n_channel * rr, "channels must equal n_channel * r * r"
    Hr, Wr, Wrr = H * r, W * r, W * rr
    total_rows = b * n_channel * H

    # P dtype: bf16 only when the input is already low precision (0/1 entries are exact);
    # f32 inputs keep an f32 P so the permutation matmul stays bit-exact.
    # TODO(synk): integer inputs go through the f32 MXU path (exact only up to 2**24).
    if x.dtype == jnp.bfloat16 or x.dtype == jnp.float16:
        p_dtype = jnp.bfloat16
    else:
        p_dtype = jnp.float32
    itemsize = jnp.dtype(x.dtype).itemsize
    p_itemsize = jnp.dtype(p_dtype).itemsize

    budget = _vmem_budget()

    # Lane-dense packing: fuse g consecutive (batch, group, h) rows into one packed
    # row of width L = g*Wrr (multiple of 128) -> unmasked stores, full MXU width.
    g = _pick_packing(total_rows, Wrr)
    L = g * Wrr
    packed_rows = total_rows // g
    x2 = x.reshape(packed_rows, L)            # free C-order view

    # Block-diagonal permutation matrix (kron(I_g, P) built directly):
    # within each Wrr segment, source lane s0 -> dest lane (s0 % r)*Wr + s0 // r.
    s = jnp.arange(L)
    seg = (s // Wrr) * Wrr
    s0 = s % Wrr
    dst = seg + (s0 % r) * Wr + s0 // r
    P = jax.nn.one_hot(dst, L, dtype=p_dtype)  # (L, L); constant index_map -> fetched once per lane tile

    tn = _pick_lane_block(L, p_itemsize, budget, forced=lane_block)
    tm = _pick_row_block(packed_rows, L, tn, itemsize, p_itemsize, budget)
    grid = (pl.cdiv(packed_rows, tm), pl.cdiv(L, tn))

    need = (2 * tm * L * itemsize + 2 * tm * tn * itemsize
            + 2 * L * tn * p_itemsize + (4 << 20))
    vmem_limit = int(max(min(need, budget), 16 << 20))
    # TODO(synk): a single-buffered P (pipeline_mode) and a copy-based (non-matmul) kernel
    # would save one P buffer and the O(L^2) multiplies-by-zero for very large W*r*r.

    out2 = pl.pallas_call(
        _ps_kernel,
        out_shape=jax.ShapeDtypeStruct((packed_rows, L), x.dtype),
        grid_spec=pltpu.PrefetchScalarGridSpec(
            num_scalar_prefetch=0,
            grid=grid,
            in_specs=[
                pl.BlockSpec((tm, L), lambda i, j: (i, 0)),    # row block (constant over j -> no re-DMA)
                pl.BlockSpec((L, tn), lambda i, j: (0, j)),    # permutation slab
            ],
            out_specs=pl.BlockSpec((tm, tn), lambda i, j: (i, j)),
        ),
        compiler_params=pltpu.CompilerParams(
            dimension_semantics=("parallel", "parallel"),
            vmem_limit_bytes=vmem_limit,
        ),
    )(x2, P)

    # Free C-order reshape: (packed_rows, L) == (b, n_channel, H, r, Wr) -> NCHW output.
    return out2.reshape(b, n_channel, Hr, Wr)


# ----------------------------------------------------------------------------- #
# Pure-JAX reference: literal translation of the torch module (for verification)
# ----------------------------------------------------------------------------- #
def _phase_shift_ref(image, r, batch_size):
    _, c, h, w = image.shape
    X = image.reshape(batch_size, h, w, r, r)          # torch .view on the chunk
    X = jnp.transpose(X, (0, 1, 2, 4, 3))
    chunks = jnp.split(X, h, axis=1)
    X = jnp.concatenate([jnp.squeeze(c_) for c_ in chunks], axis=2)
    chunks = jnp.split(X, w, axis=1)
    X = jnp.concatenate([jnp.squeeze(c_) for c_ in chunks], axis=2)
    X = X[:, :, :, None]
    return jnp.transpose(X, (0, 3, 1, 2))


def ps_forward_ref(x, r, n_channel, batch_size):
    chunks = jnp.split(x, n_channel, axis=1)
    return jnp.concatenate(
        [_phase_shift_ref(c_, r, batch_size) for c_ in chunks], axis=1)


# ----------------------------------------------------------------------------- #
if __name__ == "__main__":
    # Test 1: r=2, square spatial, multiple channel groups -> packed lane-dense path.
    batch, n_channel, r, H, W = 2, 3, 2, 16, 16
    C = n_channel * r * r                     # 12
    key = jax.random.PRNGKey(0)
    x = jax.random.normal(key, (batch, C, H, W), dtype=jnp.float32)

    out = jax.block_until_ready(ps_forward_pallas(x, r, n_channel))
    ref = ps_forward_ref(x, r, n_channel, batch)
    assert out.shape == (batch, n_channel, H * r, W * r), out.shape
    assert bool(jnp.allclose(out, ref, atol=1e-6, rtol=0)), "mismatch vs reference (dense)"

    # Same input through the lane-tiled path (second grid axis > 1), used for large W*r*r.
    out_t = jax.block_until_ready(ps_forward_pallas(x, r, n_channel, lane_block=128))
    assert bool(jnp.allclose(out_t, ref, atol=1e-6, rtol=0)), "mismatch vs reference (tiled)"

    # Test 2: r=3 and H != W validate the closed-form lane permutation beyond r=2 / square.
    b2, nc2, r2, H2, W2 = 2, 2, 3, 4, 8
    C2 = nc2 * r2 * r2                        # 18
    x_b = jax.random.normal(jax.random.PRNGKey(1), (b2, C2, H2, W2), dtype=jnp.float32)
    out2 = jax.block_until_ready(ps_forward_pallas(x_b, r2, nc2))
    ref2 = ps_forward_ref(x_b, r2, nc2, b2)
    assert out2.shape == (b2, nc2, H2 * r2, W2 * r2), out2.shape
    assert bool(jnp.allclose(out2, ref2, atol=1e-6, rtol=0)), "mismatch vs reference (r=3, H!=W)"

    print("KERNEL_OK")
</pallas_src>

<mosaic_0001>
module attributes {stable_mosaic.version = 11 : i64} {
  func.func @_ps_kernel(%arg0: i32, %arg1: i32, %arg2: memref<8x256xf32, #tpu.memory_space<vmem>>, %arg3: memref<256x256xf32, #tpu.memory_space<vmem>>, %arg4: memref<8x256xf32, #tpu.memory_space<vmem>>) attributes {dimension_semantics = [#tpu.dimension_semantics<parallel>, #tpu.dimension_semantics<parallel>], iteration_bounds = array<i64: 3, 1>, scalar_prefetch = 0 : i64, scratch_operands = 0 : i64, tpu.core_type = #tpu.core_type<tc>, window_params = [{transform_indices = @transform_0, window_bounds = array<i64: 8, 256>}, {transform_indices = @transform_1, window_bounds = array<i64: 256, 256>}, {transform_indices = @transform_2, window_bounds = array<i64: 8, 256>}]} {
    %c0 = arith.constant 0 : index
    %c0_0 = arith.constant 0 : index
    %0 = vector.load %arg2[%c0, %c0_0] : memref<8x256xf32, #tpu.memory_space<vmem>>, vector<8x256xf32>
    %c0_1 = arith.constant 0 : index
    %c0_2 = arith.constant 0 : index
    %1 = vector.load %arg3[%c0_1, %c0_2] : memref<256x256xf32, #tpu.memory_space<vmem>>, vector<256x256xf32>
    %cst = arith.constant dense<0.000000e+00> : vector<8x256xf32>
    %2 = tpu.matmul %0, %1, %cst {dimension_numbers = #tpu.dot_dimension_numbers<[1], [0], [0], [1], [0, 0, 1, 1], [], []>} : vector<8x256xf32>, vector<256x256xf32>, vector<8x256xf32> -> vector<8x256xf32>
    %c0_3 = arith.constant 0 : index
    %c0_4 = arith.constant 0 : index
    %3 = vector.load %arg4[%c0_3, %c0_4] : memref<8x256xf32, #tpu.memory_space<vmem>>, vector<8x256xf32>
    tpu.vector_store %arg4[%c0_3, %c0_4], %2 {strides = array<i32>} : memref<8x256xf32, #tpu.memory_space<vmem>>, vector<8x256xf32>,
    return
  }
  func.func @transform_0(%arg0: i32, %arg1: i32) -> (i32, i32) {
    %c0_i32 = arith.constant 0 : i32
    %c0_i32_0 = arith.constant 0 : i32
    return %arg0, %c0_i32 : i32, i32
  }
  func.func @transform_1(%arg0: i32, %arg1: i32) -> (i32, i32) {
    %c0_i32 = arith.constant 0 : i32
    %c0_i32_0 = arith.constant 0 : i32
    return %c0_i32, %arg1 : i32, i32
  }
  func.func @transform_2(%arg0: i32, %arg1: i32) -> (i32, i32) {
    %c0_i32 = arith.constant 0 : i32
    return %arg0, %arg1 : i32, i32
  }
}

</mosaic_0001>

<bundles_post_ra>
// kernel: tpu_custom_call.1
= control target key start
LH: loop header
LB: loop body
LE: loop exit
PB: predicated region body
PF: predicated region fallthrough
CT: control target
= control target key end

     0   :  { %7 = vsyncpa [#allocation3], 0  ;;  %s992_s0 = inlined_call_operand.hbm [shape: f32[24,256], index: 0, kind: input, shape index: {}]   ;;  %s993_s1 = inlined_call_operand.hbm [shape: f32[256,256], index: 1, kind: input, shape index: {}]   ;;  %s994_s2 = inlined_call_operand.hbm [shape: f32[24,256], index: 2, kind: output, shape index: {}]  }
   0x1   :  { %9 = vsyncpa [#allocation3 + $0x1], 0 }
   0x2   :  { %10 = vsyncpa [#allocation6], 0 }
   0x3   :  { %11 = vsyncpa [#allocation4], 0 }
   0x4   :  { %13 = vsyncpa [#allocation4 + $0x1], 0  ;;  %s772_s9 = smov 0   ;;  %s774_s10 = smov 0  }
   0x5   :  { %s776_s11 = smov 0   ;;  %s778_s12 = smov 0  }
   0x6   :  { %s780_s13 = smov 0   ;;  %s782_s14 = smov 0  }
   0x7 LB: > { %s448_s15 = sadd.s32 4294967295, %s750_s14   ;;  %s449_s16 = sadd.s32 4294967294, %s750_s14   ;;  %s750_s14 = sphi %s782_s14, %s19_s14   ;;  %s746_s13 = sphi %s780_s13, %s1017_s13   ;;  %s742_s12 = sphi %s778_s12, %s1016_s12   ;;  %s738_s11 = sphi %s776_s11, %s1015_s11   ;;  %s734_s10 = sphi %s774_s10, %s1014_s10   ;;  %s730_s9 = sphi %s772_s9, %s1013_s9  }
   0x8   : > { %p51_p0 = scmp.ne.s32.totalorder %s734_s10, %s730_s9  ;;  %p806_p1 = scmp.eq.s32.totalorder %s448_s15, 0 }
   0x9   : > { %p810_p2 = scmp.eq.s32.totalorder %s448_s15, 2  ;;  %p109_p3 = scmp.eq.s32.totalorder %s449_s16, 2 }
   0xa   : > { %s999_s17 = scalar_select %p806_p1, 1, 0 }
   0xb   : > { %s1000_s18 = scalar_select %p810_p2, 1, 0 }
   0xc   : > { %p816_p4 = por %p806_p1, %p51_p0  ;;  %p450_p5 = scmp.ge.s32.totalorder %s750_s14, 1 }
   0xd   : > { %p821_p6 = por %p109_p3, %p51_p0  ;;  %p116_p7 = scmp.lt.s32.totalorder %s750_s14, 4 }
   0xe   : > { %s1001_s19 = scalar_select %p816_p4, 1, 0 }
   0xf   : > { %s1002_s20 = scalar_select %p821_p6, 1, 0 }
  0x10   : > { %p826_p8 = pnand %p450_p5, %p116_p7  ;;  %s752_s22 = smov [#allocation5]  }
  0x11   : > { %s131_s23 = sshll.u32 %s752_s22, 4  ;;  %s31_s25 = sadd.s32 1, %s746_s13  ;;  %s132_s23 = int_to_ptr.vmem [resolvable:$true] %s131_s23 }
  0x12   : > { %s1003_s21 = scalar_select %p826_p8, 1, 0 }
  0x13   : > { %p539_p9 = pneg %p826_p8  ;;  %s606_s28 = scalar_lea.hbm %s993_s1, 8192 }
  0x14   : > { %p607_p11 = scmp.ne.s32.totalorder %s993_s1, %s606_s28  ;;  %p613_p3 = scmp.lt.u32.totalorder %s606_s28, %s993_s1 }
  0x15   : > { %p834_p10 = pnand %p539_p9, %p806_p1 }
  0x17   : > { %p608_p12 = pneg %p834_p10 }
  0x19   : > { %p609_p13 = pnand %p608_p12, %p607_p11 }
  0x1b   : > { %p610_p0 = pneg %p609_p13 }
  0x1d   : > { %p615_p5 = pnand %p613_p3, %p610_p0 }
  0x1f   : > { %618 = shalt.err (!%p615_p5)
}
  0x20   : > { %s619_s5 = scalar_lea.vmem %s132_s23, 8192  ;;  %p627_p1 = scmp.lt.s32.totalorder %s132_s23, %s132_s23 }
  0x21   : > { %p620_p7 = scmp.ne.s32.totalorder %s132_s23, %s619_s5  ;;  %p628_p4 = scmp.lt.s32.totalorder %s619_s5, %s619_s5 }
  0x23   : > { %p622_p9 = pnand %p620_p7, %p608_p12  ;;  %p629_p8 = por %p628_p4, %p627_p1 }
  0x25   : > { %p623_p6 = pneg %p622_p9 }
  0x27   : > { %p630_p2 = pnand %p629_p8, %p623_p6 }
  0x29   : > { %633 = shalt.err (!%p630_p2)
}
  0x2a   : > { %s753_s6 = smov 256   ;;  %s754_s7 = smov 16  }
  0x2b   : > { %542 = dma.hbm_to_vmem [thread:$0]  (!%p834_p10), %s993_s1, 8192, %s132_s23, [#allocation6], %s753_s6, %s753_s6, %s754_s7  }
  0x2c   : > { %p33_p1 = scmp.ge.s32.totalorder %s31_s25, 3  ;;  %s38_s16 = sadd.s32 1, %s738_s11 }
  0x2d   : > { %p45_p2 = scmp.ne.s32.totalorder %s738_s11, %s734_s10  ;;  %p46_p4 = scmp.eq.s32.totalorder %s750_s14, 0 }
  0x2e   : > { %s1019_s25 = smov (%p33_p1, %s31_s25), 0  ;;  %p1006_p8 = scmp.ne.s32.totalorder %s1000_s18, 0 }
  0x2f   : > { %p861_p6 = por %p46_p4, %p45_p2  ;;  %s35_s24 = ssub.s32 %s746_s13, %s1019_s25 }
  0x30   : > { %p867_p11 = por %p1006_p8, %p45_p2  ;;  %p552_p12 = scmp.lt.s32.totalorder %s750_s14, 3 }
  0x31   : > { %p36_p10 = scmp.eq.s32.totalorder %s35_s24, 0  ;;  %s145_s23 = sand.u32 1, %s738_s11  }
  0x32   : > { %s453_s27 = sshll.u32 %s145_s23, 4  ;;  %s465_s29 = sshll.u32 %s746_s13, 8 }
  0x33   : > { %s876_s28 = scalar_select %p36_p10, %s738_s11, %s38_s16  }
  0x34   : > { %s882_s4 = scalar_lea.hbm %s992_s0, %s465_s29  ;;  %s149_s18 = scalar_lea.vmem [#allocation2], %s453_s27 }
  0x35   : > { %s157_s5 = sshll.u32 %s149_s18, 4  ;;  %p888_p13 = pnand %p552_p12, %p861_p6  ;;  %s884_s5 = int_to_ptr.vmem [resolvable:$true] %s157_s5 }
  0x36   : > { %s146_s7 = scalar_lea.sflag [#allocation3], %s145_s23  ;;  %s634_s8 = scalar_lea.hbm %s882_s4, 256 }
  0x37   : > { %p635_p0 = scmp.ne.s32.totalorder %s882_s4, %s634_s8  ;;  %p636_p3 = pneg %p888_p13 }
  0x38   : > { %s639_s24 = scalar_lea.hbm %s992_s0, 768  ;;  %p640_p9 = scmp.lt.u32.totalorder %s882_s4, %s992_s0 }
  0x39   : > { %p637_p5 = pnand %p636_p3, %p635_p0  ;;  %p641_p1 = scmp.lt.u32.totalorder %s639_s24, %s634_s8 }
  0x3a   : > { %p643_p4 = scmp.lt.u32.totalorder %s634_s8, %s882_s4 }
  0x3b   : > { %p638_p7 = pneg %p637_p5  ;;  %p642_p2 = por %p641_p1, %p640_p9 }
  0x3d   : > { %p644_p6 = por %p643_p4, %p642_p2 }
  0x3f   : > { %p645_p8 = pnand %p644_p6, %p638_p7 }
  0x41   : > { %648 = shalt.err (!%p645_p8)
}
  0x42   : > { %s649_s23 = scalar_lea.vmem %s884_s5, 256  ;;  %s755_s29 = smov [#allocation2]  }
  0x43   : > { %p650_p12 = scmp.ne.s32.totalorder %s884_s5, %s649_s23  ;;  %s654_s30 = sshll.u32 %s755_s29, 4  ;;  %s655_s30 = int_to_ptr.vmem [resolvable:$false] %s654_s30 }
  0x44   : > { %s656_s3 = scalar_lea.vmem %s655_s30, 512  ;;  %p657_p5 = scmp.lt.s32.totalorder %s884_s5, %s655_s30 }
  0x45   : > { %p652_p10 = pnand %p650_p12, %p636_p3  ;;  %p658_p9 = scmp.lt.s32.totalorder %s656_s3, %s649_s23 }
  0x47   : > { %p653_p0 = pneg %p652_p10  ;;  %p659_p1 = por %p658_p9, %p657_p5 }
  0x49   : > { %p660_p2 = pnand %p659_p1, %p653_p0 }
  0x4b   : > { %663 = shalt.err (!%p660_p2)
}
  0x4c   : > { %546 = dma.hbm_to_vmem [thread:$0]  (!%p888_p13), %s882_s4, 256, %s884_s5, %s146_s7  }
  0x4d   : > { %p1009_p7 = scmp.ne.s32.totalorder %s1003_s21, 0 }
  0x4e   : > { %s920_s18 = sand.u32 (!%p1009_p7), 1, %s734_s10   ;;  %p1010_p3 = scmp.ne.s32.totalorder (!%p1009_p7), %s1001_s19, 0 }
  0x4f   : > { %166 = sbr.rel (%p1009_p7) target bundleno = 384 (0x180), region = 28  ;;  %s457_s8 = sshll.u32 (!%p1009_p7), %s920_s18, 4 }
  0x50   : > { %s169_s15 = scalar_lea.sflag (!%p1009_p7), [#allocation3], %s920_s18  ;;  %s926_s16 = scalar_lea.vmem (!%p1009_p7), [#allocation2], %s457_s8 }
  0x56   : > { %717 = dma.done.wait (%p1010_p3), %s169_s15, 256  }
  0x57   : > { %719 = vsyncadd (%p1010_p3), %s169_s15, 4294967040  ;;  %p1011_p13 = scmp.ne.s32.totalorder %s999_s17, 0 }
  0x59   : > { %721 = dma.done.wait (%p1011_p13), [#allocation6], 8192  }
  0x5a   : > { %723 = vsyncadd (%p1011_p13), [#allocation6], 4294959104  ;;  %v202_v0 = vld [vmem:[#allocation5 + $0x8] sm:$0xff]  ;;  %v204_v1 = vld [vmem:[#allocation5 + $0x18] sm:$0xff]  ;;  %s196_s17 = scalar_lea.vmem [#allocation7], %s457_s8  ;;  %s466_s21 = sshll.u32 %s742_s12, 8 }
  0x5b   : > { %v201_v2 = vld [vmem:[#allocation5] sm:$0xff]  ;;  %v467_v3 = vpack.c.bf16 %v204_v1, %v202_v0  ;;  %v203_v4 = vld [vmem:[#allocation5 + $0x10] sm:$0xff]  ;;  %v206_v5 = vld [vmem:[#allocation5 + $0x28] sm:$0xff]  ;;  %s355_s19 = sshll.u32 %s196_s17, 4  ;;  %s946_s6 = scalar_lea.hbm %s994_s2, %s466_s21  ;;  %s941_s19 = int_to_ptr.vmem [resolvable:$true] %s355_s19 }
  0x5c   : > { %v208_v6 = vld [vmem:[#allocation5 + $0x38] sm:$0xff]  ;;  %v469_v7 = vpack.c.bf16 %v203_v4, %v201_v2  ;;  %v205_v9 = vld [vmem:[#allocation5 + $0x20] sm:$0xff]  ;;  %v207_v10 = vld [vmem:[#allocation5 + $0x30] sm:$0xff]  ;;  %s339_s7 = scalar_lea.sflag [#allocation4], %s920_s18  ;;  %s664_s24 = scalar_lea.vmem %s941_s19, 256 }
  0x5d   : > { %v471_v8 = vpack.c.bf16 %v208_v6, %v206_v5  ;;  %v210_v11 = vld [vmem:[#allocation5 + $0x48] sm:$0xff]  ;;  %468 = vmatprep.subr.bf16.mxu0 %v467_v3  ;;  %v212_v12 = vld [vmem:[#allocation5 + $0x58] sm:$0xff]  ;;  %v473_v13 = vpack.c.bf16 %v207_v10, %v205_v9  ;;  %v209_v15 = vld [vmem:[#allocation5 + $0x40] sm:$0xff]  ;;  %p665_p4 = scmp.ne.s32.totalorder %s941_s19, %s664_s24  ;;  %s756_s12 = smov [#allocation7]  }
  0x5e   : > { %470 = vmatpush1.bf16.msra.mxu0 %v469_v7  ;;  %v475_v14 = vpack.c.bf16 %v212_v12, %v210_v11  ;;  %v211_v16 = vld [vmem:[#allocation5 + $0x50] sm:$0xff]  ;;  %v214_v17 = vld [vmem:[#allocation5 + $0x68] sm:$0xff]  ;;  %v216_v18 = vld [vmem:[#allocation5 + $0x78] sm:$0xff]  ;;  %s668_s22 = sshll.u32 %s756_s12, 4  ;;  %s669_s22 = int_to_ptr.vmem [resolvable:$false] %s668_s22 }
  0x5f   : > { %472 = vmatprep.subr.bf16.mxu0 %v471_v8  ;;  %v477_v19 = vpack.c.bf16 %v211_v16, %v209_v15  ;;  %v479_v20 = vpack.c.bf16 %v216_v18, %v214_v17  ;;  %v213_v21 = vld [vmem:[#allocation5 + $0x60] sm:$0xff]  ;;  %v215_v22 = vld [vmem:[#allocation5 + $0x70] sm:$0xff]  ;;  %v218_v23 = vld [vmem:[#allocation5 + $0x88] sm:$0xff]  ;;  %p666_p6 = pnand %p665_p4, %p867_p11  ;;  %s670_s27 = scalar_lea.vmem %s669_s22, 512 }
  0x60   : > { %v220_v24 = vld [vmem:[#allocation5 + $0x98] sm:$0xff]  ;;  %v481_v25 = vpack.c.bf16 %v215_v22, %v213_v21  ;;  %v217_v27 = vld [vmem:[#allocation5 + $0x80] sm:$0xff]  ;;  %v219_v28 = vld [vmem:[#allocation5 + $0x90] sm:$0xff]  ;;  %p671_p12 = scmp.lt.s32.totalorder %s941_s19, %s669_s22  ;;  %p672_p10 = scmp.lt.s32.totalorder %s670_s27, %s664_s24 }
  0x61   : > { %v483_v26 = vpack.c.bf16 %v220_v24, %v218_v23  ;;  %v222_v29 = vld [vmem:[#allocation5 + $0xa8] sm:$0xff]  ;;  %v224_v30 = vld [vmem:[#allocation5 + $0xb8] sm:$0xff]  ;;  %v485_v31 = vpack.c.bf16 %v219_v28, %v217_v27  ;;  %v221_v33 = vld [vmem:[#allocation5 + $0xa0] sm:$0xff]  ;;  %p667_p8 = pneg %p666_p6 }
  0x62   : > { %474 = vmatpush1.bf16.msra.mxu0 %v473_v13  ;;  %v487_v32 = vpack.c.bf16 %v224_v30, %v222_v29  ;;  %v223_v34 = vld [vmem:[#allocation5 + $0xb0] sm:$0xff]  ;;  %v226_v35 = vld [vmem:[#allocation5 + $0xc8] sm:$0xff]  ;;  %v228_v36 = vld [vmem:[#allocation5 + $0xd8] sm:$0xff]  ;;  %p673_p0 = por %p672_p10, %p671_p12 }
  0x63   : > { %476 = vmatprep.subr.bf16.mxu0 %v475_v14  ;;  %v489_v37 = vpack.c.bf16 %v223_v34, %v221_v33  ;;  %v491_v38 = vpack.c.bf16 %v228_v36, %v226_v35  ;;  %v225_v39 = vld [vmem:[#allocation5 + $0xc0] sm:$0xff]  ;;  %v227_v40 = vld [vmem:[#allocation5 + $0xd0] sm:$0xff]  ;;  %v200_v41 = vld [vmem:[%s926_s16 + $0x8] sm:$0xff] }
  0x64   : > { %v230_v42 = vld [vmem:[#allocation5 + $0xe8] sm:$0xff]  ;;  %v232_v43 = vld [vmem:[#allocation5 + $0xf8] sm:$0xff]  ;;  %329 = vmatprep.mubr.f32.mxu0 %v200_v41  ;;  %v493_v44 = vpack.c.bf16 %v227_v40, %v225_v39  ;;  %v229_v46 = vld [vmem:[#allocation5 + $0xe0] sm:$0xff]  ;;  %p674_p5 = pnand %p673_p0, %p667_p8 }
  0x65   : > { %v495_v45 = vpack.c.bf16 %v232_v43, %v230_v42  ;;  %v231_v47 = vld [vmem:[#allocation5 + $0xf0] sm:$0xff]  ;;  %v234_v48 = vld [vmem:[#allocation5 + $0x108] sm:$0xff]  ;;  %v236_v49 = vld [vmem:[#allocation5 + $0x118] sm:$0xff] }
  0x66   : > { %478 = vmatpush1.bf16.msra.mxu0 %v477_v19  ;;  %v497_v50 = vpack.c.bf16 %v231_v47, %v229_v46  ;;  %v499_v51 = vpack.c.bf16 %v236_v49, %v234_v48  ;;  %v233_v52 = vld [vmem:[#allocation5 + $0x100] sm:$0xff]  ;;  %v235_v53 = vld [vmem:[#allocation5 + $0x110] sm:$0xff]  ;;  %v238_v54 = vld [vmem:[#allocation5 + $0x128] sm:$0xff] }
  0x67   : > { %480 = vmatprep.subr.bf16.mxu0 %v479_v20  ;;  %v240_v55 = vld [vmem:[#allocation5 + $0x138] sm:$0xff]  ;;  %v501_v56 = vpack.c.bf16 %v235_v53, %v233_v52  ;;  %v237_v58 = vld [vmem:[#allocation5 + $0x120] sm:$0xff]  ;;  %v239_v59 = vld [vmem:[#allocation5 + $0x130] sm:$0xff] }
  0x68   : > { %v503_v57 = vpack.c.bf16 %v240_v55, %v238_v54  ;;  %v242_v60 = vld [vmem:[#allocation5 + $0x148] sm:$0xff]  ;;  %v244_v61 = vld [vmem:[#allocation5 + $0x158] sm:$0xff]  ;;  %v505_v62 = vpack.c.bf16 %v239_v59, %v237_v58  ;;  %v241_v0 = vld [vmem:[#allocation5 + $0x140] sm:$0xff] }
  0x69   : > { %v507_v63 = vpack.c.bf16 %v244_v61, %v242_v60  ;;  %v243_v1 = vld [vmem:[#allocation5 + $0x150] sm:$0xff]  ;;  %v246_v2 = vld [vmem:[#allocation5 + $0x168] sm:$0xff]  ;;  %v248_v3 = vld [vmem:[#allocation5 + $0x178] sm:$0xff] }
  0x6a   : > { %482 = vmatpush1.bf16.msra.mxu0 %v481_v25  ;;  %v509_v4 = vpack.c.bf16 %v243_v1, %v241_v0  ;;  %v511_v5 = vpack.c.bf16 %v248_v3, %v246_v2  ;;  %v245_v6 = vld [vmem:[#allocation5 + $0x160] sm:$0xff]  ;;  %v247_v7 = vld [vmem:[#allocation5 + $0x170] sm:$0xff]  ;;  %v250_v8 = vld [vmem:[#allocation5 + $0x188] sm:$0xff] }
  0x6b   : > { %484 = vmatprep.subr.bf16.mxu0 %v483_v26  ;;  %v252_v9 = vld [vmem:[#allocation5 + $0x198] sm:$0xff]  ;;  %v513_v10 = vpack.c.bf16 %v247_v7, %v245_v6  ;;  %v249_v12 = vld [vmem:[#allocation5 + $0x180] sm:$0xff]  ;;  %v251_v13 = vld [vmem:[#allocation5 + $0x190] sm:$0xff] }
  0x6c   : > { %v515_v11 = vpack.c.bf16 %v252_v9, %v250_v8  ;;  %v254_v14 = vld [vmem:[#allocation5 + $0x1a8] sm:$0xff]  ;;  %v256_v15 = vld [vmem:[#allocation5 + $0x1b8] sm:$0xff]  ;;  %v517_v16 = vpack.c.bf16 %v251_v13, %v249_v12  ;;  %v253_v18 = vld [vmem:[#allocation5 + $0x1a0] sm:$0xff] }
  0x6d   : > { %v519_v17 = vpack.c.bf16 %v256_v15, %v254_v14  ;;  %v255_v19 = vld [vmem:[#allocation5 + $0x1b0] sm:$0xff]  ;;  %v258_v20 = vld [vmem:[#allocation5 + $0x1c8] sm:$0xff]  ;;  %v260_v21 = vld [vmem:[#allocation5 + $0x1d8] sm:$0xff] }
  0x6e   : > { %486 = vmatpush1.bf16.msra.mxu0 %v485_v31  ;;  %v521_v22 = vpack.c.bf16 %v255_v19, %v253_v18  ;;  %v523_v23 = vpack.c.bf16 %v260_v21, %v258_v20  ;;  %v257_v24 = vld [vmem:[#allocation5 + $0x1c0] sm:$0xff]  ;;  %v259_v25 = vld [vmem:[#allocation5 + $0x1d0] sm:$0xff]  ;;  %v262_v26 = vld [vmem:[#allocation5 + $0x1e8] sm:$0xff] }
  0x6f   : > { %488 = vmatprep.subr.bf16.mxu0 %v487_v32  ;;  %v264_v27 = vld [vmem:[#allocation5 + $0x1f8] sm:$0xff]  ;;  %v525_v28 = vpack.c.bf16 %v259_v25, %v257_v24  ;;  %v261_v30 = vld [vmem:[#allocation5 + $0x1e0] sm:$0xff]  ;;  %v263_v31 = vld [vmem:[#allocation5 + $0x1f0] sm:$0xff] }
  0x70   : > { %v527_v29 = vpack.c.bf16 %v264_v27, %v262_v26  ;;  %v529_v32 = vpack.c.bf16 %v263_v31, %v261_v30  ;;  %v199_v33 = vld [vmem:[%s926_s16] sm:$0xff] }
  0x72   : > { %490 = vmatpush1.bf16.msra.mxu0 %v489_v37 }
  0x73   : > { %492 = vmatprep.subr.bf16.mxu0 %v491_v38 }
  0x76   : > { %494 = vmatpush1.bf16.msra.mxu0 %v493_v44 }
  0x77   : > { %496 = vmatprep.subr.bf16.mxu0 %v495_v45 }
  0x7a   : > { %498 = vmatpush1.bf16.msra.mxu0 %v497_v50 }
  0x7b   : > { %500 = vmatprep.subr.bf16.mxu0 %v499_v51 }
  0x7e   : > { %502 = vmatpush1.bf16.msra.mxu0 %v501_v56 }
  0x7f   : > { %504 = vmatprep.subr.bf16.mxu0 %v503_v57 }
  0x82   : > { %506 = vmatpush1.bf16.msra.mxu0 %v505_v62 }
  0x83   : > { %508 = vmatprep.subr.bf16.mxu0 %v507_v63 }
  0x86   : > { %510 = vmatpush1.bf16.msra.mxu0 %v509_v4 }
  0x87   : > { %512 = vmatprep.subr.bf16.mxu0 %v511_v5 }
  0x8a   : > { %514 = vmatpush1.bf16.msra.mxu0 %v513_v10 }
  0x8b   : > { %516 = vmatprep.subr.bf16.mxu0 %v515_v11 }
  0x8e   : > { %518 = vmatpush1.bf16.msra.mxu0 %v517_v16 }
  0x8f   : > { %520 = vmatprep.subr.bf16.mxu0 %v519_v17 }
  0x92   : > { %522 = vmatpush1.bf16.msra.mxu0 %v521_v22 }
  0x93   : > { %524 = vmatprep.subr.bf16.mxu0 %v523_v23 }
  0x96   : > { %526 = vmatpush1.bf16.msra.mxu0 %v525_v28 }
  0x97   : > { %528 = vmatprep.subr.bf16.mxu0 %v527_v29 }
  0x9a   : > { %530 = vmatpush1.bf16.msra.mxu0 %v529_v32 }
  0x9d   : > { %330 = vmatmul.mubr.f32.vlgmr.msra.gmra.mrb[0].mxu0 %v199_v33 }
 0x170   : > { %v331_v34 = vpop.f32.mrb[0].mxu0 }
 0x171   : > { %336 = vst [vmem:[%s196_s17] sm:$0xff] %v331_v34  ;;  %v333_v35 = vpop.f32.mrb[1].mxu0 }
 0x172   : > { %337 = vst [vmem:[%s196_s17 + $0x8] sm:$0xff] %v333_v35 }
 0x173   : > { %677 = shalt.err (!%p674_p5)
}
 0x174   : > { %s678_s23 = scalar_lea.hbm %s946_s6, 256  ;;  %s682_s3 = scalar_lea.hbm %s994_s2, 768 }
 0x175   : > { %p679_p9 = scmp.ne.s32.totalorder %s946_s6, %s678_s23  ;;  %p683_p7 = scmp.lt.u32.totalorder %s946_s6, %s994_s2 }
 0x176   : > { %p684_p3 = scmp.lt.u32.totalorder %s682_s3, %s678_s23  ;;  %p686_p4 = scmp.lt.u32.totalorder %s678_s23, %s946_s6 }
 0x177   : > { %p680_p1 = pnand %p679_p9, %p867_p11 }
 0x178   : > { %p685_p13 = por %p684_p3, %p683_p7 }
 0x179   : > { %p681_p2 = pneg %p680_p1 }
 0x17a   : > { %p687_p6 = por %p686_p4, %p685_p13 }
 0x17c   : > { %p688_p8 = pnand %p687_p6, %p681_p2 }
 0x17e   : > { %691 = shalt.err (!%p688_p8)
}
 0x17f   : > { %537 = dma.vmem_to_hbm [thread:$0]  (%p867_p11), %s941_s19, 256, %s946_s6, %s339_s7  }
 0x180 PF: > { %p554_p12 = scmp.ge.s32.totalorder %s750_s14, 2  ;;  %s367_s15 = sand.u32 1, %s730_s9  }
 0x181   : > { %p1012_p10 = scmp.ne.s32.totalorder %s1002_s20, 0  ;;  %s368_s16 = scalar_lea.sflag [#allocation4], %s367_s15 }
 0x183   : > { %p548_p0 = pnand %p554_p12, %p1012_p10 }
 0x185   : > { %725 = dma.done.wait (!%p548_p0), %s368_s16, 256  }
 0x186   : > { %727 = vsyncadd (!%p548_p0), %s368_s16, 4294967040  ;;  %s19_s14 = sadd.s32 1, %s750_s14   ;;  %s1013_s9 = smov %s734_s10 }
 0x187   : > { %p16_p5 = scmp.ge.s32.totalorder %s19_s14, 5   ;;  %s1014_s10 = smov %s738_s11 }
 0x188   : > { %s1015_s11 = smov %s876_s28  ;;  %s1016_s12 = smov %s746_s13 }
 0x189   : > { %s1017_s13 = smov %s1019_s25  ;;  %18 = sbr.rel (!%p16_p5) target bundleno = 7 (0x7), region = 78 }
 0x190   :  { %373 = vsyncpa [#allocation3], 1 }
 0x191   :  { %375 = vsyncpa [#allocation3 + $0x1], 1 }
 0x192   :  { %376 = vsyncpa [#allocation6], 1 }
 0x193   :  { %377 = vsyncpa [#allocation4], 1 }
 0x194   :  { %379 = vsyncpa [#allocation4 + $0x1], 1 }

</bundles_post_ra>
